<compile_context>
chip_gen: v6e
topology: v6e:2x2x1
jax: 0.10.0
libtpu: 0.0.40
codegen_flags: <defaults>
</compile_context>

<pallas_src>
import functools

import jax
import jax.numpy as jnp
from jax.experimental import pallas as pl
from jax.experimental.pallas import tpu as pltpu

NUM_LAYERS = 20
FEATURES = 10
AUG = FEATURES + 1  # homogeneous-coordinate width (extra ones column)


def _chain_linear_kernel(w_ref, x_ref, o_ref):
    """Apply NUM_LAYERS sequential affine layers in one kernel invocation.

    w_ref : (NUM_LAYERS, AUG, AUG) bf16 — augmented weights [[W^T, 0], [b, 1]]
    x_ref : (B_tile, AUG) f32 — input with trailing ones column
    o_ref : (B_tile, FEATURES)
    """
    x = x_ref[...].astype(jnp.float32)  # carried in registers across the chain
    for i in range(NUM_LAYERS):         # static unrolled serial chain
        # (B, AUG) @ (AUG, AUG): bf16 MXU inputs, f32 accumulation.
        x = jnp.dot(x.astype(jnp.bfloat16), w_ref[i],
                    preferred_element_type=jnp.float32)
    o_ref[...] = x[:, :FEATURES].astype(o_ref.dtype)


def _pack_weights(weights, biases):
    """(L, out, in) torch-layout weights + (L, out) biases -> (L, AUG, AUG) bf16
    augmented matrices [[W^T, 0], [b, 1]] so that [x, 1] @ W_aug == [x @ W^T + b, 1]."""
    wt = jnp.transpose(weights, (0, 2, 1))                                     # (L, in, out)
    top = jnp.concatenate(
        [wt, jnp.zeros((NUM_LAYERS, FEATURES, 1), wt.dtype)], axis=2)          # (L, F, AUG)
    bot = jnp.concatenate(
        [biases[:, None, :], jnp.ones((NUM_LAYERS, 1, 1), biases.dtype)], axis=2)  # (L, 1, AUG)
    return jnp.concatenate([top, bot], axis=1).astype(jnp.bfloat16)            # (L, AUG, AUG)


@functools.partial(jax.jit, static_argnames=("batch_tile",))
def module_list_forward(x, weights, biases, *, batch_tile=256):
    """x: (B, 10). weights: (20, 10, 10) in PyTorch (out, in) layout. biases: (20, 10)."""
    B, F = x.shape
    assert F == FEATURES
    assert weights.shape == (NUM_LAYERS, FEATURES, FEATURES)
    assert biases.shape == (NUM_LAYERS, FEATURES)

    w_aug = _pack_weights(weights, biases)                               # (L, AUG, AUG) bf16
    x_aug = jnp.concatenate([x, jnp.ones((B, 1), x.dtype)], axis=1)      # (B, AUG)
    out_shape = jax.ShapeDtypeStruct((B, FEATURES), x.dtype)

    if B % batch_tile == 0 and B // batch_tile > 1:
        # Large batch: 1-D parallel grid over batch tiles (v7x: sharded across both
        # TensorCores). Weights (~5 KB) stay resident via a constant index_map.
        grid_spec = pltpu.PrefetchScalarGridSpec(
            num_scalar_prefetch=0,
            grid=(B // batch_tile,),
            in_specs=[
                pl.BlockSpec((NUM_LAYERS, AUG, AUG), lambda i: (0, 0, 0)),
                pl.BlockSpec((batch_tile, AUG), lambda i: (i, 0)),
            ],
            out_specs=pl.BlockSpec((batch_tile, FEATURES), lambda i: (i, 0)),
        )
        return pl.pallas_call(
            _chain_linear_kernel,
            out_shape=out_shape,
            grid_spec=grid_spec,
            compiler_params=pltpu.CompilerParams(
                dimension_semantics=("parallel",)),
        )(w_aug, x_aug)

    # Small batch (v5e/v6e or tiny B): single invocation, everything resident in VMEM.
    vmem = pl.BlockSpec(memory_space=pltpu.MemorySpace.VMEM)
    return pl.pallas_call(
        _chain_linear_kernel,
        out_shape=out_shape,
        in_specs=[vmem, vmem],
        out_specs=vmem,
    )(w_aug, x_aug)


if __name__ == "__main__":
    key = jax.random.PRNGKey(0)
    kx, kw, kb = jax.random.split(key, 3)

    # Deterministic synthetic parameters (shapes from nn.Linear(10, 10) x 20).
    weights = 0.1 * jax.random.normal(kw, (NUM_LAYERS, FEATURES, FEATURES), dtype=jnp.float32)
    biases = 0.1 * jax.random.normal(kb, (NUM_LAYERS, FEATURES), dtype=jnp.float32)

    def reference(xv):
        y = xv
        for i in range(NUM_LAYERS):
            y = y @ weights[i].T + biases[i]
        return y

    # Small-batch path (no grid; the v5e/v6e-style single invocation).
    x_small = jax.random.normal(kx, (8, FEATURES), dtype=jnp.float32)
    out_small = jax.block_until_ready(module_list_forward(x_small, weights, biases))
    assert out_small.shape == (8, FEATURES)
    assert jnp.allclose(out_small, reference(x_small), atol=2e-2, rtol=2e-2), \
        "small-batch mismatch vs reference"

    # Large-batch path (parallel batch grid; v7x can use both TensorCores).
    x_big = jax.random.normal(kx, (1024, FEATURES), dtype=jnp.float32)
    out_big = jax.block_until_ready(
        module_list_forward(x_big, weights, biases, batch_tile=256))
    assert out_big.shape == (1024, FEATURES)
    assert jnp.allclose(out_big, reference(x_big), atol=2e-2, rtol=2e-2), \
        "large-batch mismatch vs reference"

    print("KERNEL_OK")
</pallas_src>

<mosaic_0001>
module attributes {stable_mosaic.version = 11 : i64} {
  func.func @_chain_linear_kernel(%arg0: memref<20x11x11xbf16, #tpu.memory_space<vmem>>, %arg1: memref<8x11xf32, #tpu.memory_space<vmem>>, %arg2: memref<8x10xf32, #tpu.memory_space<vmem>>) attributes {dimension_semantics = [], scalar_prefetch = 0 : i64, scratch_operands = 0 : i64, tpu.core_type = #tpu.core_type<tc>} {
    %c0 = arith.constant 0 : index
    %c0_0 = arith.constant 0 : index
    %0 = vector.load %arg1[%c0, %c0_0] : memref<8x11xf32, #tpu.memory_space<vmem>>, vector<8x11xf32>
    %1 = arith.truncf %0 : vector<8x11xf32> to vector<8x11xbf16>
    %c0_1 = arith.constant 0 : index
    %c0_2 = arith.constant 0 : index
    %c0_3 = arith.constant 0 : index
    %2 = vector.load %arg0[%c0_1, %c0_2, %c0_3] : memref<20x11x11xbf16, #tpu.memory_space<vmem>>, vector<1x11x11xbf16>
    %3 = vector.shape_cast %2 : vector<1x11x11xbf16> to vector<11x11xbf16>
    %cst = arith.constant dense<0.000000e+00> : vector<8x11xf32>
    %4 = tpu.matmul %1, %3, %cst {dimension_numbers = #tpu.dot_dimension_numbers<[1], [0], [0], [1], [0, 0, 1, 1], [], []>} : vector<8x11xbf16>, vector<11x11xbf16>, vector<8x11xf32> -> vector<8x11xf32>
    %5 = arith.truncf %4 : vector<8x11xf32> to vector<8x11xbf16>
    %c1 = arith.constant 1 : index
    %c0_4 = arith.constant 0 : index
    %c0_5 = arith.constant 0 : index
    %6 = vector.load %arg0[%c1, %c0_4, %c0_5] : memref<20x11x11xbf16, #tpu.memory_space<vmem>>, vector<1x11x11xbf16>
    %7 = vector.shape_cast %6 : vector<1x11x11xbf16> to vector<11x11xbf16>
    %cst_6 = arith.constant dense<0.000000e+00> : vector<8x11xf32>
    %8 = tpu.matmul %5, %7, %cst_6 {dimension_numbers = #tpu.dot_dimension_numbers<[1], [0], [0], [1], [0, 0, 1, 1], [], []>} : vector<8x11xbf16>, vector<11x11xbf16>, vector<8x11xf32> -> vector<8x11xf32>
    %9 = arith.truncf %8 : vector<8x11xf32> to vector<8x11xbf16>
    %c2 = arith.constant 2 : index
    %c0_7 = arith.constant 0 : index
    %c0_8 = arith.constant 0 : index
    %10 = vector.load %arg0[%c2, %c0_7, %c0_8] : memref<20x11x11xbf16, #tpu.memory_space<vmem>>, vector<1x11x11xbf16>
    %11 = vector.shape_cast %10 : vector<1x11x11xbf16> to vector<11x11xbf16>
    %cst_9 = arith.constant dense<0.000000e+00> : vector<8x11xf32>
    %12 = tpu.matmul %9, %11, %cst_9 {dimension_numbers = #tpu.dot_dimension_numbers<[1], [0], [0], [1], [0, 0, 1, 1], [], []>} : vector<8x11xbf16>, vector<11x11xbf16>, vector<8x11xf32> -> vector<8x11xf32>
    %13 = arith.truncf %12 : vector<8x11xf32> to vector<8x11xbf16>
    %c3 = arith.constant 3 : index
    %c0_10 = arith.constant 0 : index
    %c0_11 = arith.constant 0 : index
    %14 = vector.load %arg0[%c3, %c0_10, %c0_11] : memref<20x11x11xbf16, #tpu.memory_space<vmem>>, vector<1x11x11xbf16>
    %15 = vector.shape_cast %14 : vector<1x11x11xbf16> to vector<11x11xbf16>
    %cst_12 = arith.constant dense<0.000000e+00> : vector<8x11xf32>
    %16 = tpu.matmul %13, %15, %cst_12 {dimension_numbers = #tpu.dot_dimension_numbers<[1], [0], [0], [1], [0, 0, 1, 1], [], []>} : vector<8x11xbf16>, vector<11x11xbf16>, vector<8x11xf32> -> vector<8x11xf32>
    %17 = arith.truncf %16 : vector<8x11xf32> to vector<8x11xbf16>
    %c4 = arith.constant 4 : index
    %c0_13 = arith.constant 0 : index
    %c0_14 = arith.constant 0 : index
    %18 = vector.load %arg0[%c4, %c0_13, %c0_14] : memref<20x11x11xbf16, #tpu.memory_space<vmem>>, vector<1x11x11xbf16>
    %19 = vector.shape_cast %18 : vector<1x11x11xbf16> to vector<11x11xbf16>
    %cst_15 = arith.constant dense<0.000000e+00> : vector<8x11xf32>
    %20 = tpu.matmul %17, %19, %cst_15 {dimension_numbers = #tpu.dot_dimension_numbers<[1], [0], [0], [1], [0, 0, 1, 1], [], []>} : vector<8x11xbf16>, vector<11x11xbf16>, vector<8x11xf32> -> vector<8x11xf32>
    %21 = arith.truncf %20 : vector<8x11xf32> to vector<8x11xbf16>
    %c5 = arith.constant 5 : index
    %c0_16 = arith.constant 0 : index
    %c0_17 = arith.constant 0 : index
    %22 = vector.load %arg0[%c5, %c0_16, %c0_17] : memref<20x11x11xbf16, #tpu.memory_space<vmem>>, vector<1x11x11xbf16>
    %23 = vector.shape_cast %22 : vector<1x11x11xbf16> to vector<11x11xbf16>
    %cst_18 = arith.constant dense<0.000000e+00> : vector<8x11xf32>
    %24 = tpu.matmul %21, %23, %cst_18 {dimension_numbers = #tpu.dot_dimension_numbers<[1], [0], [0], [1], [0, 0, 1, 1], [], []>} : vector<8x11xbf16>, vector<11x11xbf16>, vector<8x11xf32> -> vector<8x11xf32>
    %25 = arith.truncf %24 : vector<8x11xf32> to vector<8x11xbf16>
    %c6 = arith.constant 6 : index
    %c0_19 = arith.constant 0 : index
    %c0_20 = arith.constant 0 : index
    %26 = vector.load %arg0[%c6, %c0_19, %c0_20] : memref<20x11x11xbf16, #tpu.memory_space<vmem>>, vector<1x11x11xbf16>
    %27 = vector.shape_cast %26 : vector<1x11x11xbf16> to vector<11x11xbf16>
    %cst_21 = arith.constant dense<0.000000e+00> : vector<8x11xf32>
    %28 = tpu.matmul %25, %27, %cst_21 {dimension_numbers = #tpu.dot_dimension_numbers<[1], [0], [0], [1], [0, 0, 1, 1], [], []>} : vector<8x11xbf16>, vector<11x11xbf16>, vector<8x11xf32> -> vector<8x11xf32>
    %29 = arith.truncf %28 : vector<8x11xf32> to vector<8x11xbf16>
    %c7 = arith.constant 7 : index
    %c0_22 = arith.constant 0 : index
    %c0_23 = arith.constant 0 : index
    %30 = vector.load %arg0[%c7, %c0_22, %c0_23] : memref<20x11x11xbf16, #tpu.memory_space<vmem>>, vector<1x11x11xbf16>
    %31 = vector.shape_cast %30 : vector<1x11x11xbf16> to vector<11x11xbf16>
    %cst_24 = arith.constant dense<0.000000e+00> : vector<8x11xf32>
    %32 = tpu.matmul %29, %31, %cst_24 {dimension_numbers = #tpu.dot_dimension_numbers<[1], [0], [0], [1], [0, 0, 1, 1], [], []>} : vector<8x11xbf16>, vector<11x11xbf16>, vector<8x11xf32> -> vector<8x11xf32>
    %33 = arith.truncf %32 : vector<8x11xf32> to vector<8x11xbf16>
    %c8 = arith.constant 8 : index
    %c0_25 = arith.constant 0 : index
    %c0_26 = arith.constant 0 : index
    %34 = vector.load %arg0[%c8, %c0_25, %c0_26] : memref<20x11x11xbf16, #tpu.memory_space<vmem>>, vector<1x11x11xbf16>
    %35 = vector.shape_cast %34 : vector<1x11x11xbf16> to vector<11x11xbf16>
    %cst_27 = arith.constant dense<0.000000e+00> : vector<8x11xf32>
    %36 = tpu.matmul %33, %35, %cst_27 {dimension_numbers = #tpu.dot_dimension_numbers<[1], [0], [0], [1], [0, 0, 1, 1], [], []>} : vector<8x11xbf16>, vector<11x11xbf16>, vector<8x11xf32> -> vector<8x11xf32>
    %37 = arith.truncf %36 : vector<8x11xf32> to vector<8x11xbf16>
    %c9 = arith.constant 9 : index
    %c0_28 = arith.constant 0 : index
    %c0_29 = arith.constant 0 : index
    %38 = vector.load %arg0[%c9, %c0_28, %c0_29] : memref<20x11x11xbf16, #tpu.memory_space<vmem>>, vector<1x11x11xbf16>
    %39 = vector.shape_cast %38 : vector<1x11x11xbf16> to vector<11x11xbf16>
    %cst_30 = arith.constant dense<0.000000e+00> : vector<8x11xf32>
    %40 = tpu.matmul %37, %39, %cst_30 {dimension_numbers = #tpu.dot_dimension_numbers<[1], [0], [0], [1], [0, 0, 1, 1], [], []>} : vector<8x11xbf16>, vector<11x11xbf16>, vector<8x11xf32> -> vector<8x11xf32>
    %41 = arith.truncf %40 : vector<8x11xf32> to vector<8x11xbf16>
    %c10 = arith.constant 10 : index
    %c0_31 = arith.constant 0 : index
    %c0_32 = arith.constant 0 : index
    %42 = vector.load %arg0[%c10, %c0_31, %c0_32] : memref<20x11x11xbf16, #tpu.memory_space<vmem>>, vector<1x11x11xbf16>
    %43 = vector.shape_cast %42 : vector<1x11x11xbf16> to vector<11x11xbf16>
    %cst_33 = arith.constant dense<0.000000e+00> : vector<8x11xf32>
    %44 = tpu.matmul %41, %43, %cst_33 {dimension_numbers = #tpu.dot_dimension_numbers<[1], [0], [0], [1], [0, 0, 1, 1], [], []>} : vector<8x11xbf16>, vector<11x11xbf16>, vector<8x11xf32> -> vector<8x11xf32>
    %45 = arith.truncf %44 : vector<8x11xf32> to vector<8x11xbf16>
    %c11 = arith.constant 11 : index
    %c0_34 = arith.constant 0 : index
    %c0_35 = arith.constant 0 : index
    %46 = vector.load %arg0[%c11, %c0_34, %c0_35] : memref<20x11x11xbf16, #tpu.memory_space<vmem>>, vector<1x11x11xbf16>
    %47 = vector.shape_cast %46 : vector<1x11x11xbf16> to vector<11x11xbf16>
    %cst_36 = arith.constant dense<0.000000e+00> : vector<8x11xf32>
    %48 = tpu.matmul %45, %47, %cst_36 {dimension_numbers = #tpu.dot_dimension_numbers<[1], [0], [0], [1], [0, 0, 1, 1], [], []>} : vector<8x11xbf16>, vector<11x11xbf16>, vector<8x11xf32> -> vector<8x11xf32>
    %49 = arith.truncf %48 : vector<8x11xf32> to vector<8x11xbf16>
    %c12 = arith.constant 12 : index
    %c0_37 = arith.constant 0 : index
    %c0_38 = arith.constant 0 : index
    %50 = vector.load %arg0[%c12, %c0_37, %c0_38] : memref<20x11x11xbf16, #tpu.memory_space<vmem>>, vector<1x11x11xbf16>
    %51 = vector.shape_cast %50 : vector<1x11x11xbf16> to vector<11x11xbf16>
    %cst_39 = arith.constant dense<0.000000e+00> : vector<8x11xf32>
    %52 = tpu.matmul %49, %51, %cst_39 {dimension_numbers = #tpu.dot_dimension_numbers<[1], [0], [0], [1], [0, 0, 1, 1], [], []>} : vector<8x11xbf16>, vector<11x11xbf16>, vector<8x11xf32> -> vector<8x11xf32>
    %53 = arith.truncf %52 : vector<8x11xf32> to vector<8x11xbf16>
    %c13 = arith.constant 13 : index
    %c0_40 = arith.constant 0 : index
    %c0_41 = arith.constant 0 : index
    %54 = vector.load %arg0[%c13, %c0_40, %c0_41] : memref<20x11x11xbf16, #tpu.memory_space<vmem>>, vector<1x11x11xbf16>
    %55 = vector.shape_cast %54 : vector<1x11x11xbf16> to vector<11x11xbf16>
    %cst_42 = arith.constant dense<0.000000e+00> : vector<8x11xf32>
    %56 = tpu.matmul %53, %55, %cst_42 {dimension_numbers = #tpu.dot_dimension_numbers<[1], [0], [0], [1], [0, 0, 1, 1], [], []>} : vector<8x11xbf16>, vector<11x11xbf16>, vector<8x11xf32> -> vector<8x11xf32>
    %57 = arith.truncf %56 : vector<8x11xf32> to vector<8x11xbf16>
    %c14 = arith.constant 14 : index
    %c0_43 = arith.constant 0 : index
    %c0_44 = arith.constant 0 : index
    %58 = vector.load %arg0[%c14, %c0_43, %c0_44] : memref<20x11x11xbf16, #tpu.memory_space<vmem>>, vector<1x11x11xbf16>
    %59 = vector.shape_cast %58 : vector<1x11x11xbf16> to vector<11x11xbf16>
    %cst_45 = arith.constant dense<0.000000e+00> : vector<8x11xf32>
    %60 = tpu.matmul %57, %59, %cst_45 {dimension_numbers = #tpu.dot_dimension_numbers<[1], [0], [0], [1], [0, 0, 1, 1], [], []>} : vector<8x11xbf16>, vector<11x11xbf16>, vector<8x11xf32> -> vector<8x11xf32>
    %61 = arith.truncf %60 : vector<8x11xf32> to vector<8x11xbf16>
    %c15 = arith.constant 15 : index
    %c0_46 = arith.constant 0 : index
    %c0_47 = arith.constant 0 : index
    %62 = vector.load %arg0[%c15, %c0_46, %c0_47] : memref<20x11x11xbf16, #tpu.memory_space<vmem>>, vector<1x11x11xbf16>
    %63 = vector.shape_cast %62 : vector<1x11x11xbf16> to vector<11x11xbf16>
    %cst_48 = arith.constant dense<0.000000e+00> : vector<8x11xf32>
    %64 = tpu.matmul %61, %63, %cst_48 {dimension_numbers = #tpu.dot_dimension_numbers<[1], [0], [0], [1], [0, 0, 1, 1], [], []>} : vector<8x11xbf16>, vector<11x11xbf16>, vector<8x11xf32> -> vector<8x11xf32>
    %65 = arith.truncf %64 : vector<8x11xf32> to vector<8x11xbf16>
    %c16 = arith.constant 16 : index
    %c0_49 = arith.constant 0 : index
    %c0_50 = arith.constant 0 : index
    %66 = vector.load %arg0[%c16, %c0_49, %c0_50] : memref<20x11x11xbf16, #tpu.memory_space<vmem>>, vector<1x11x11xbf16>
    %67 = vector.shape_cast %66 : vector<1x11x11xbf16> to vector<11x11xbf16>
    %cst_51 = arith.constant dense<0.000000e+00> : vector<8x11xf32>
    %68 = tpu.matmul %65, %67, %cst_51 {dimension_numbers = #tpu.dot_dimension_numbers<[1], [0], [0], [1], [0, 0, 1, 1], [], []>} : vector<8x11xbf16>, vector<11x11xbf16>, vector<8x11xf32> -> vector<8x11xf32>
    %69 = arith.truncf %68 : vector<8x11xf32> to vector<8x11xbf16>
    %c17 = arith.constant 17 : index
    %c0_52 = arith.constant 0 : index
    %c0_53 = arith.constant 0 : index
    %70 = vector.load %arg0[%c17, %c0_52, %c0_53] : memref<20x11x11xbf16, #tpu.memory_space<vmem>>, vector<1x11x11xbf16>
    %71 = vector.shape_cast %70 : vector<1x11x11xbf16> to vector<11x11xbf16>
    %cst_54 = arith.constant dense<0.000000e+00> : vector<8x11xf32>
    %72 = tpu.matmul %69, %71, %cst_54 {dimension_numbers = #tpu.dot_dimension_numbers<[1], [0], [0], [1], [0, 0, 1, 1], [], []>} : vector<8x11xbf16>, vector<11x11xbf16>, vector<8x11xf32> -> vector<8x11xf32>
    %73 = arith.truncf %72 : vector<8x11xf32> to vector<8x11xbf16>
    %c18 = arith.constant 18 : index
    %c0_55 = arith.constant 0 : index
    %c0_56 = arith.constant 0 : index
    %74 = vector.load %arg0[%c18, %c0_55, %c0_56] : memref<20x11x11xbf16, #tpu.memory_space<vmem>>, vector<1x11x11xbf16>
    %75 = vector.shape_cast %74 : vector<1x11x11xbf16> to vector<11x11xbf16>
    %cst_57 = arith.constant dense<0.000000e+00> : vector<8x11xf32>
    %76 = tpu.matmul %73, %75, %cst_57 {dimension_numbers = #tpu.dot_dimension_numbers<[1], [0], [0], [1], [0, 0, 1, 1], [], []>} : vector<8x11xbf16>, vector<11x11xbf16>, vector<8x11xf32> -> vector<8x11xf32>
    %77 = arith.truncf %76 : vector<8x11xf32> to vector<8x11xbf16>
    %c19 = arith.constant 19 : index
    %c0_58 = arith.constant 0 : index
    %c0_59 = arith.constant 0 : index
    %78 = vector.load %arg0[%c19, %c0_58, %c0_59] : memref<20x11x11xbf16, #tpu.memory_space<vmem>>, vector<1x11x11xbf16>
    %79 = vector.shape_cast %78 : vector<1x11x11xbf16> to vector<11x11xbf16>
    %cst_60 = arith.constant dense<0.000000e+00> : vector<8x11xf32>
    %80 = tpu.matmul %77, %79, %cst_60 {dimension_numbers = #tpu.dot_dimension_numbers<[1], [0], [0], [1], [0, 0, 1, 1], [], []>} : vector<8x11xbf16>, vector<11x11xbf16>, vector<8x11xf32> -> vector<8x11xf32>
    %81 = vector.extract_strided_slice %80 {offsets = [0, 0], sizes = [8, 10], strides = [1, 1]} : vector<8x11xf32> to vector<8x10xf32>
    %c0_61 = arith.constant 0 : index
    %c0_62 = arith.constant 0 : index
    %82 = vector.load %arg2[%c0_61, %c0_62] : memref<8x10xf32, #tpu.memory_space<vmem>>, vector<8x10xf32>
    tpu.vector_store %arg2[%c0_61, %c0_62], %81 {strides = array<i32>} : memref<8x10xf32, #tpu.memory_space<vmem>>, vector<8x10xf32>,
    return
  }
}

</mosaic_0001>

<bundles_post_ra>
// kernel: module_list_forward.1
= control target key start
LH: loop header
LB: loop body
LE: loop exit
PB: predicated region body
PF: predicated region fallthrough
CT: control target
= control target key end

     0   :  { %vm26_vm0 = vcmask 1044480   ;;  %v1418_v0 = vmov 0.0   ;;  %vm27_vm1 = vcmask 1045504   ;;  %v1419_v2 = vmov 65535   ;;  %s1605_s0 = inlined_call_operand.vmem [shape: bf16[20,11,11], index: 0, kind: input, shape index: {}]   ;;  %s1606_s1 = inlined_call_operand.vmem [shape: f32[8,11], index: 1, kind: input, shape index: {}]   ;;  %s1607_s2 = inlined_call_operand.hbm [shape: f32[8,10], index: 2, kind: output, shape index: {}]  }
   0x1   :  { %1252 = vmatprep.subr.bf16.mxu0 %v1418_v0  ;;  %v1376_v1 = vld [vmem:[%s1605_s0] sm:$0x3f]   ;;  %1258 = vmatprep.subr.bf16.mxu1 %v1418_v0  ;;  %v28_v3 = vsel %vm26_vm0, 4294967295, %v1419_v2  ;;  %vm1420_vm2 = vmmov 0   ;;  %vm22_vm3 = vcmask 89088  }
   0x2   :  { %1254 = vmatprep.mubr.msk.bf16.mxu0 %vm1420_vm2, %v1418_v0  ;;  %v13_v4 = vld [vmem:[%s1606_s1] sm:$0xff]  ;;  %1260 = vmatprep.mubr.msk.bf16.mxu1 %vm1420_vm2, %v1418_v0  ;;  %v1449_v5 = vsel %vm27_vm1, %v28_v3, 0 }
   0x3   :  { %v31_v6 = vand.u32 %v1376_v1, %v1449_v5  ;;  %v14_v7 = vpack.c.bf16 %v13_v4, %v13_v4 }
   0x5   :  { %1253 = vmatpush3.bf16.msra.mxu0 %v31_v6 }
   0x6   :  { %1264 = vmatprep.subr.bf16.mxu0 %v1418_v0 }
   0x8   :  { %1255 = vmatmul.mubr.msk.bf16.vlgmr.msra.gmra.mxu0 %vm22_vm3, %v14_v7 }
   0x9   :  { %1266 = vmatprep.mubr.msk.bf16.mxu0 %vm1420_vm2, %v1418_v0 }
   0xa   :  { %7 = vsyncpa [#allocation3], 0  ;;  %v1377_v8 = vld [vmem:[%s1605_s0 + $0x8] sm:$0x3f]   ;;  %v1378_v10 = vld [vmem:[%s1605_s0 + $0x10] sm:$0x3f]  }
   0xb   :  { %v86_v9 = vand.u32 %v1377_v8, %v1449_v5  ;;  %v141_v11 = vand.u32 %v1378_v10, %v1449_v5  ;;  %v1379_v17 = vld [vmem:[%s1605_s0 + $0x18] sm:$0x3f]   ;;  %v1380_v24 = vld [vmem:[%s1605_s0 + $0x20] sm:$0x3f]   ;;  %v1381_v31 = vld [vmem:[%s1605_s0 + $0x28] sm:$0x3f]  }
   0xc   :  { %v196_v18 = vand.u32 %v1379_v17, %v1449_v5  ;;  %v251_v25 = vand.u32 %v1380_v24, %v1449_v5  ;;  %v306_v32 = vand.u32 %v1381_v31, %v1449_v5  ;;  %v1382_v38 = vld [vmem:[%s1605_s0 + $0x30] sm:$0x3f]   ;;  %v1383_v45 = vld [vmem:[%s1605_s0 + $0x38] sm:$0x3f]   ;;  %v1384_v52 = vld [vmem:[%s1605_s0 + $0x40] sm:$0x3f]  }
   0xd   :  { %1259 = vmatpush3.bf16.msra.mxu1 %v86_v9  ;;  %1265 = vmatpush3.bf16.msra.mxu0 %v141_v11  ;;  %v361_v39 = vand.u32 %v1382_v38, %v1449_v5  ;;  %v416_v46 = vand.u32 %v1383_v45, %v1449_v5  ;;  %v471_v53 = vand.u32 %v1384_v52, %v1449_v5  ;;  %v1385_v59 = vld [vmem:[%s1605_s0 + $0x48] sm:$0x3f]   ;;  %v1386_v3 = vld [vmem:[%s1605_s0 + $0x50] sm:$0x3f]   ;;  %v1387_v11 = vld [vmem:[%s1605_s0 + $0x58] sm:$0x3f]  }
   0xe   :  { %1270 = vmatprep.subr.bf16.mxu1 %v1418_v0  ;;  %1276 = vmatprep.subr.bf16.mxu0 %v1418_v0  ;;  %v526_v60 = vand.u32 %v1385_v59, %v1449_v5  ;;  %v581_v4 = vand.u32 %v1386_v3, %v1449_v5  ;;  %s1421_s21 = smov [#allocation2]   ;;  %vm1118_vm4 = vcmask 80896  }
   0xf   :  { %s1126_s22 = sshll.u32 %s1421_s21, 4  ;;  %s1127_s22 = int_to_ptr.vmem [resolvable:$true] %s1126_s22 }
  0x10   :  { %p1401_p1 = scmp.lt.s32.totalorder %s1127_s22, %s1127_s22 }
  0xc8   :  { %v67_v12 = vpop.f32.mrf.mxu0 }
  0xc9   :  { %v73_v13 = vpack.c.bf16 %v67_v12, %v67_v12  ;;  %v636_v12 = vand.u32 %v1387_v11, %v1449_v5 }
  0xca   :  { %v1256_v14 = vpop.f32.mrf.mxu0 }
  0xcb   :  { %1261 = vmatmul.mubr.msk.bf16.vlgmr.msra.gmra.mxu1 %vm22_vm3, %v73_v13 }
  0xcc   :  { %v70_v15 = vpop.f32.mrf.mxu0  ;;  %1272 = vmatprep.mubr.msk.bf16.mxu1 %vm1420_vm2, %v1418_v0  ;;  %1271 = vmatpush3.bf16.msra.mxu1 %v196_v18  ;;  %v1388_v18 = vld [vmem:[%s1605_s0 + $0x60] sm:$0x3f]  }
  0xcd   :  { %1282 = vmatprep.subr.bf16.mxu1 %v1418_v0 }
  0xce   :  { %v1257_v16 = vpop.f32.mrf.mxu0 }
 0x18b   :  { %v122_v19 = vpop.f32.mrf.mxu1 }
 0x18c   :  { %v128_v20 = vpack.c.bf16 %v122_v19, %v122_v19  ;;  %v691_v19 = vand.u32 %v1388_v18, %v1449_v5 }
 0x18d   :  { %v1262_v21 = vpop.f32.mrf.mxu1 }
 0x18e   :  { %1267 = vmatmul.mubr.msk.bf16.vlgmr.msra.gmra.mxu0 %vm22_vm3, %v128_v20 }
 0x18f   :  { %v125_v22 = vpop.f32.mrf.mxu1  ;;  %1278 = vmatprep.mubr.msk.bf16.mxu0 %vm1420_vm2, %v1418_v0  ;;  %1277 = vmatpush3.bf16.msra.mxu0 %v251_v25  ;;  %v1389_v25 = vld [vmem:[%s1605_s0 + $0x68] sm:$0x3f]  }
 0x190   :  { %1288 = vmatprep.subr.bf16.mxu0 %v1418_v0 }
 0x191   :  { %v1263_v23 = vpop.f32.mrf.mxu1 }
 0x24e   :  { %v177_v26 = vpop.f32.mrf.mxu0 }
 0x24f   :  { %v183_v27 = vpack.c.bf16 %v177_v26, %v177_v26  ;;  %v746_v26 = vand.u32 %v1389_v25, %v1449_v5 }
 0x250   :  { %v1268_v28 = vpop.f32.mrf.mxu0 }
 0x251   :  { %1273 = vmatmul.mubr.msk.bf16.vlgmr.msra.gmra.mxu1 %vm22_vm3, %v183_v27 }
 0x252   :  { %v180_v29 = vpop.f32.mrf.mxu0  ;;  %1284 = vmatprep.mubr.msk.bf16.mxu1 %vm1420_vm2, %v1418_v0  ;;  %1283 = vmatpush3.bf16.msra.mxu1 %v306_v32  ;;  %v1390_v32 = vld [vmem:[%s1605_s0 + $0x70] sm:$0x3f]  }
 0x253   :  { %1294 = vmatprep.subr.bf16.mxu1 %v1418_v0 }
 0x254   :  { %v1269_v30 = vpop.f32.mrf.mxu0 }
 0x311   :  { %v232_v33 = vpop.f32.mrf.mxu1 }
 0x312   :  { %v238_v34 = vpack.c.bf16 %v232_v33, %v232_v33  ;;  %v801_v33 = vand.u32 %v1390_v32, %v1449_v5 }
 0x313   :  { %v1274_v35 = vpop.f32.mrf.mxu1 }
 0x314   :  { %1279 = vmatmul.mubr.msk.bf16.vlgmr.msra.gmra.mxu0 %vm22_vm3, %v238_v34 }
 0x315   :  { %v235_v36 = vpop.f32.mrf.mxu1  ;;  %1290 = vmatprep.mubr.msk.bf16.mxu0 %vm1420_vm2, %v1418_v0  ;;  %1289 = vmatpush3.bf16.msra.mxu0 %v361_v39  ;;  %v1391_v39 = vld [vmem:[%s1605_s0 + $0x78] sm:$0x3f]  }
 0x316   :  { %1300 = vmatprep.subr.bf16.mxu0 %v1418_v0 }
 0x317   :  { %v1275_v37 = vpop.f32.mrf.mxu1 }
 0x3d4   :  { %v287_v40 = vpop.f32.mrf.mxu0 }
 0x3d5   :  { %v293_v41 = vpack.c.bf16 %v287_v40, %v287_v40  ;;  %v856_v40 = vand.u32 %v1391_v39, %v1449_v5 }
 0x3d6   :  { %v1280_v42 = vpop.f32.mrf.mxu0 }
 0x3d7   :  { %1285 = vmatmul.mubr.msk.bf16.vlgmr.msra.gmra.mxu1 %vm22_vm3, %v293_v41 }
 0x3d8   :  { %v290_v43 = vpop.f32.mrf.mxu0  ;;  %1296 = vmatprep.mubr.msk.bf16.mxu1 %vm1420_vm2, %v1418_v0  ;;  %1295 = vmatpush3.bf16.msra.mxu1 %v416_v46  ;;  %v1392_v46 = vld [vmem:[%s1605_s0 + $0x80] sm:$0x3f]  }
 0x3d9   :  { %1306 = vmatprep.subr.bf16.mxu1 %v1418_v0 }
 0x3da   :  { %v1281_v44 = vpop.f32.mrf.mxu0 }
 0x497   :  { %v342_v47 = vpop.f32.mrf.mxu1 }
 0x498   :  { %v348_v48 = vpack.c.bf16 %v342_v47, %v342_v47  ;;  %v911_v47 = vand.u32 %v1392_v46, %v1449_v5 }
 0x499   :  { %v1286_v49 = vpop.f32.mrf.mxu1 }
 0x49a   :  { %1291 = vmatmul.mubr.msk.bf16.vlgmr.msra.gmra.mxu0 %vm22_vm3, %v348_v48 }
 0x49b   :  { %v345_v50 = vpop.f32.mrf.mxu1  ;;  %1302 = vmatprep.mubr.msk.bf16.mxu0 %vm1420_vm2, %v1418_v0  ;;  %1301 = vmatpush3.bf16.msra.mxu0 %v471_v53  ;;  %v1393_v53 = vld [vmem:[%s1605_s0 + $0x88] sm:$0x3f]  }
 0x49c   :  { %1312 = vmatprep.subr.bf16.mxu0 %v1418_v0 }
 0x49d   :  { %v1287_v51 = vpop.f32.mrf.mxu1 }
 0x55a   :  { %v397_v54 = vpop.f32.mrf.mxu0 }
 0x55b   :  { %v403_v55 = vpack.c.bf16 %v397_v54, %v397_v54  ;;  %v966_v54 = vand.u32 %v1393_v53, %v1449_v5 }
 0x55c   :  { %v1292_v56 = vpop.f32.mrf.mxu0 }
 0x55d   :  { %1297 = vmatmul.mubr.msk.bf16.vlgmr.msra.gmra.mxu1 %vm22_vm3, %v403_v55 }
 0x55e   :  { %v400_v57 = vpop.f32.mrf.mxu0  ;;  %1308 = vmatprep.mubr.msk.bf16.mxu1 %vm1420_vm2, %v1418_v0  ;;  %1307 = vmatpush3.bf16.msra.mxu1 %v526_v60  ;;  %v1394_v60 = vld [vmem:[%s1605_s0 + $0x90] sm:$0x3f]  }
 0x55f   :  { %1318 = vmatprep.subr.bf16.mxu1 %v1418_v0 }
 0x560   :  { %v1293_v58 = vpop.f32.mrf.mxu0 }
 0x61d   :  { %v452_v61 = vpop.f32.mrf.mxu1 }
 0x61e   :  { %v458_v62 = vpack.c.bf16 %v452_v61, %v452_v61  ;;  %v1021_v61 = vand.u32 %v1394_v60, %v1449_v5 }
 0x61f   :  { %v1298_v63 = vpop.f32.mrf.mxu1 }
 0x620   :  { %1303 = vmatmul.mubr.msk.bf16.vlgmr.msra.gmra.mxu0 %vm22_vm3, %v458_v62 }
 0x621   :  { %v455_v1 = vpop.f32.mrf.mxu1  ;;  %1314 = vmatprep.mubr.msk.bf16.mxu0 %vm1420_vm2, %v1418_v0  ;;  %1313 = vmatpush3.bf16.msra.mxu0 %v581_v4  ;;  %v1395_v4 = vld [vmem:[%s1605_s0 + $0x98] sm:$0x3f]   ;;  %s1396_s0 = scalar_lea.vmem %s1127_s22, 128 }
 0x622   :  { %1324 = vmatprep.subr.bf16.mxu0 %v1418_v0  ;;  %p1397_p0 = scmp.ne.s32.totalorder %s1127_s22, %s1396_s0  ;;  %p1402_p2 = scmp.lt.s32.totalorder %s1396_s0, %s1396_s0 }
 0x623   :  { %v1299_v2 = vpop.f32.mrf.mxu1 }
 0x624   :  { %p1403_p3 = por %p1402_p2, %p1401_p1 }
 0x626   :  { %p1404_p4 = pnand %p1403_p3, %p1397_p0 }
 0x6e0   :  { %v507_v6 = vpop.f32.mrf.mxu0 }
 0x6e1   :  { %v513_v7 = vpack.c.bf16 %v507_v6, %v507_v6  ;;  %v1076_v6 = vand.u32 %v1395_v4, %v1449_v5 }
 0x6e2   :  { %v1304_v8 = vpop.f32.mrf.mxu0 }
 0x6e3   :  { %1309 = vmatmul.mubr.msk.bf16.vlgmr.msra.gmra.mxu1 %vm22_vm3, %v513_v7 }
 0x6e4   :  { %v510_v9 = vpop.f32.mrf.mxu0  ;;  %1320 = vmatprep.mubr.msk.bf16.mxu1 %vm1420_vm2, %v1418_v0  ;;  %1319 = vmatpush3.bf16.msra.mxu1 %v636_v12 }
 0x6e5   :  { %1330 = vmatprep.subr.bf16.mxu1 %v1418_v0 }
 0x6e6   :  { %v1305_v10 = vpop.f32.mrf.mxu0 }
 0x7a3   :  { %v562_v13 = vpop.f32.mrf.mxu1 }
 0x7a4   :  { %v568_v14 = vpack.c.bf16 %v562_v13, %v562_v13 }
 0x7a5   :  { %v1310_v15 = vpop.f32.mrf.mxu1 }
 0x7a6   :  { %1315 = vmatmul.mubr.msk.bf16.vlgmr.msra.gmra.mxu0 %vm22_vm3, %v568_v14 }
 0x7a7   :  { %v565_v16 = vpop.f32.mrf.mxu1  ;;  %1326 = vmatprep.mubr.msk.bf16.mxu0 %vm1420_vm2, %v1418_v0  ;;  %1325 = vmatpush3.bf16.msra.mxu0 %v691_v19 }
 0x7a8   :  { %1336 = vmatprep.subr.bf16.mxu0 %v1418_v0 }
 0x7a9   :  { %v1311_v17 = vpop.f32.mrf.mxu1 }
 0x866   :  { %v617_v20 = vpop.f32.mrf.mxu0 }
 0x867   :  { %v623_v21 = vpack.c.bf16 %v617_v20, %v617_v20 }
 0x868   :  { %v1316_v22 = vpop.f32.mrf.mxu0 }
 0x869   :  { %1321 = vmatmul.mubr.msk.bf16.vlgmr.msra.gmra.mxu1 %vm22_vm3, %v623_v21 }
 0x86a   :  { %v620_v23 = vpop.f32.mrf.mxu0  ;;  %1332 = vmatprep.mubr.msk.bf16.mxu1 %vm1420_vm2, %v1418_v0  ;;  %1331 = vmatpush3.bf16.msra.mxu1 %v746_v26 }
 0x86b   :  { %1342 = vmatprep.subr.bf16.mxu1 %v1418_v0 }
 0x86c   :  { %v1317_v24 = vpop.f32.mrf.mxu0 }
 0x929   :  { %v672_v27 = vpop.f32.mrf.mxu1 }
 0x92a   :  { %v678_v28 = vpack.c.bf16 %v672_v27, %v672_v27 }
 0x92b   :  { %v1322_v29 = vpop.f32.mrf.mxu1 }
 0x92c   :  { %1327 = vmatmul.mubr.msk.bf16.vlgmr.msra.gmra.mxu0 %vm22_vm3, %v678_v28 }
 0x92d   :  { %v675_v30 = vpop.f32.mrf.mxu1  ;;  %1338 = vmatprep.mubr.msk.bf16.mxu0 %vm1420_vm2, %v1418_v0  ;;  %1337 = vmatpush3.bf16.msra.mxu0 %v801_v33 }
 0x92e   :  { %1348 = vmatprep.subr.bf16.mxu0 %v1418_v0 }
 0x92f   :  { %v1323_v31 = vpop.f32.mrf.mxu1 }
 0x9ec   :  { %v727_v34 = vpop.f32.mrf.mxu0 }
 0x9ed   :  { %v733_v35 = vpack.c.bf16 %v727_v34, %v727_v34 }
 0x9ee   :  { %v1328_v36 = vpop.f32.mrf.mxu0 }
 0x9ef   :  { %1333 = vmatmul.mubr.msk.bf16.vlgmr.msra.gmra.mxu1 %vm22_vm3, %v733_v35 }
 0x9f0   :  { %v730_v37 = vpop.f32.mrf.mxu0  ;;  %1344 = vmatprep.mubr.msk.bf16.mxu1 %vm1420_vm2, %v1418_v0  ;;  %1343 = vmatpush3.bf16.msra.mxu1 %v856_v40 }
 0x9f1   :  { %1354 = vmatprep.subr.bf16.mxu1 %v1418_v0 }
 0x9f2   :  { %v1329_v38 = vpop.f32.mrf.mxu0 }
 0xaaf   :  { %v782_v41 = vpop.f32.mrf.mxu1 }
 0xab0   :  { %v788_v42 = vpack.c.bf16 %v782_v41, %v782_v41 }
 0xab1   :  { %v1334_v43 = vpop.f32.mrf.mxu1 }
 0xab2   :  { %1339 = vmatmul.mubr.msk.bf16.vlgmr.msra.gmra.mxu0 %vm22_vm3, %v788_v42 }
 0xab3   :  { %v785_v44 = vpop.f32.mrf.mxu1  ;;  %1350 = vmatprep.mubr.msk.bf16.mxu0 %vm1420_vm2, %v1418_v0  ;;  %1349 = vmatpush3.bf16.msra.mxu0 %v911_v47 }
 0xab4   :  { %1360 = vmatprep.subr.bf16.mxu0 %v1418_v0 }
 0xab5   :  { %v1335_v45 = vpop.f32.mrf.mxu1 }
 0xb72   :  { %v837_v48 = vpop.f32.mrf.mxu0 }
 0xb73   :  { %v843_v49 = vpack.c.bf16 %v837_v48, %v837_v48 }
 0xb74   :  { %v1340_v50 = vpop.f32.mrf.mxu0 }
 0xb75   :  { %1345 = vmatmul.mubr.msk.bf16.vlgmr.msra.gmra.mxu1 %vm22_vm3, %v843_v49 }
 0xb76   :  { %v840_v51 = vpop.f32.mrf.mxu0  ;;  %1356 = vmatprep.mubr.msk.bf16.mxu1 %vm1420_vm2, %v1418_v0  ;;  %1355 = vmatpush3.bf16.msra.mxu1 %v966_v54 }
 0xb77   :  { %1366 = vmatprep.subr.bf16.mxu1 %v1418_v0 }
 0xb78   :  { %v1341_v52 = vpop.f32.mrf.mxu0 }
 0xc35   :  { %v892_v55 = vpop.f32.mrf.mxu1 }
 0xc36   :  { %v898_v56 = vpack.c.bf16 %v892_v55, %v892_v55 }
 0xc37   :  { %v1346_v57 = vpop.f32.mrf.mxu1 }
 0xc38   :  { %1351 = vmatmul.mubr.msk.bf16.vlgmr.msra.gmra.mxu0 %vm22_vm3, %v898_v56 }
 0xc39   :  { %v895_v58 = vpop.f32.mrf.mxu1  ;;  %1362 = vmatprep.mubr.msk.bf16.mxu0 %vm1420_vm2, %v1418_v0  ;;  %1361 = vmatpush3.bf16.msra.mxu0 %v1021_v61 }
 0xc3b   :  { %v1347_v59 = vpop.f32.mrf.mxu1 }
 0xcf8   :  { %v947_v62 = vpop.f32.mrf.mxu0 }
 0xcf9   :  { %v953_v63 = vpack.c.bf16 %v947_v62, %v947_v62 }
 0xcfa   :  { %v1352_v1 = vpop.f32.mrf.mxu0 }
 0xcfb   :  { %1357 = vmatmul.mubr.msk.bf16.vlgmr.msra.gmra.mxu1 %vm22_vm3, %v953_v63 }
 0xcfc   :  { %v950_v2 = vpop.f32.mrf.mxu0  ;;  %1368 = vmatprep.mubr.msk.bf16.mxu1 %vm1420_vm2, %v1418_v0  ;;  %1367 = vmatpush3.bf16.msra.mxu1 %v1076_v6 }
 0xcfe   :  { %v1353_v3 = vpop.f32.mrf.mxu0 }
 0xdbb   :  { %v1002_v7 = vpop.f32.mrf.mxu1 }
 0xdbc   :  { %v1008_v8 = vpack.c.bf16 %v1002_v7, %v1002_v7 }
 0xdbd   :  { %v1358_v9 = vpop.f32.mrf.mxu1 }
 0xdbe   :  { %1363 = vmatmul.mubr.msk.bf16.vlgmr.msra.gmra.mxu0 %vm22_vm3, %v1008_v8 }
 0xdbf   :  { %v1005_v10 = vpop.f32.mrf.mxu1 }
 0xdc1   :  { %v1359_v11 = vpop.f32.mrf.mxu1 }
 0xe7e   :  { %v1057_v12 = vpop.f32.mrf.mxu0 }
 0xe7f   :  { %v1063_v13 = vpack.c.bf16 %v1057_v12, %v1057_v12 }
 0xe80   :  { %v1364_v14 = vpop.f32.mrf.mxu0 }
 0xe81   :  { %1369 = vmatmul.mubr.msk.bf16.vlgmr.msra.gmra.mxu1 %vm22_vm3, %v1063_v13 }
 0xe82   :  { %v1060_v0 = vpop.f32.mrf.mxu0 }
 0xe84   :  { %v1365_v15 = vpop.f32.mrf.mxu0 }
 0xf41   :  { %v1112_v5 = vpop.f32.mrf.mxu1 }
 0xf42   :  { %1119 = vst.msk [vmem:[#allocation2] sm:$0xff] %vm1118_vm4, %v1112_v5 }
 0xf43   :  { %v1370_v16 = vpop.f32.mrf.mxu1 }
 0xf44   :  { %1407 = shalt.err (!%p1404_p4)
}
 0xf45   :  { %1129 = dma.vmem_to_hbm [thread:$0]  %s1127_s22, 128, %s1607_s2, [#allocation3]   ;;  %v1115_v17 = vpop.f32.mrf.mxu1 }
 0xf47   :  { %v1371_v18 = vpop.f32.mrf.mxu1 }
 0xf48   :  { %1416 = dma.done.wait [#allocation3], 128  }
 0xf49   :  { %1417 = vsyncadd [#allocation3], 4294967168 }
 0xf4a   :  { %1133 = vsyncpa [#allocation3], 1 }

</bundles_post_ra>
